<compile_context>
chip_gen: v7x
topology: tpu7x:2x2x1
jax: 0.10.0
libtpu: 0.0.40
codegen_flags: <defaults>
</compile_context>

<pallas_src>
import functools

import jax
import jax.numpy as jnp
from jax import lax
from jax.experimental import pallas as pl
from jax.experimental.pallas import tpu as pltpu

_LANES = 128


def _focal_loss_kernel(x_ref, t_ref, out_ref, acc_ref, *,
                       alpha, gamma, rows_valid, block_rows, chunk_rows,
                       n_inner, n_blocks, need_row_mask, has_dup_blocks):
    o = pl.program_id(0)
    i = pl.program_id(1)
    block_id = o * n_inner + i

    @pl.when(i == 0)
    def _():
        acc_ref[...] = jnp.zeros_like(acc_ref)

    n_chunks = block_rows // chunk_rows

    def chunk_body(c, carry):
        r0 = c * chunk_rows
        if not isinstance(r0, int):
            r0 = pl.multiple_of(r0, chunk_rows)
        x = x_ref[pl.ds(r0, chunk_rows), :].astype(jnp.float32)
        t = t_ref[pl.ds(r0, chunk_rows), :].astype(jnp.float32)

        # Numerically-stable BCE-with-logits (same formula PyTorch uses):
        #   bce = max(x, 0) - x*t + log1p(exp(-|x|))
        bce = jnp.maximum(x, 0.0) - x * t + jnp.log1p(jnp.exp(-jnp.abs(x)))
        pt = jnp.exp(-bce)
        omp = 1.0 - pt

        g = float(gamma)
        if g == 2.0:
            focal_w = omp * omp                     # gamma=2 specialization
        elif g.is_integer() and g >= 0.0:
            focal_w = lax.integer_pow(omp, int(g))
        else:
            focal_w = omp ** jnp.float32(g)

        f = focal_w * bce
        if float(alpha) != 1.0:
            f = jnp.float32(alpha) * f

        if need_row_mask:
            # Generated only when a partial final block exists: one row-iota,
            # one add, one compare, one select (row-level, no 64-bit index).
            gid = (block_id * block_rows + r0
                   + lax.broadcasted_iota(jnp.int32, (chunk_rows, _LANES), 0))
            f = jnp.where(gid < rows_valid, f, 0.0)

        # Per-vreg partial sums (VPU only); single cross-lane reduce at the
        # end of the inner grid axis.
        if chunk_rows % 8 == 0:
            acc_ref[...] += jnp.sum(
                f.reshape(chunk_rows // 8, 8, _LANES), axis=0)
        else:
            acc_ref[0:1, :] += jnp.sum(f, axis=0, keepdims=True)
        return carry

    def process_block():
        if n_chunks == 1:
            chunk_body(0, 0)
        else:
            lax.fori_loop(0, n_chunks, chunk_body, 0,
                          unroll=True if n_chunks <= 8 else 8)

    if has_dup_blocks:
        # Grid is an even (n_outer, n_inner) factorization of an odd block
        # count; skip the duplicated (clamped) tail block.
        pl.when(block_id < n_blocks)(process_block)
    else:
        process_block()

    @pl.when(i == pl.num_programs(1) - 1)
    def _():
        out_ref[0, 0] = jnp.sum(acc_ref[...])


def focal_loss(inputs, targets, alpha=1.0, gamma=2.0,
               block_rows=8192, chunk_rows=1024, n_outer_max=2):
    """Pallas focal loss over arbitrarily-shaped logits/targets (same shape)."""
    assert inputs.shape == targets.shape
    n = int(inputs.size)
    if n == 0:
        return jnp.float32(float("nan"))

    x_flat = inputs.reshape(-1)
    t_flat = targets.reshape(-1)

    # Fast path: no wrapper-side copy when n is lane-aligned.  Otherwise pad
    # only the <=127-element remainder with (logit=+100, target=1), whose
    # focal contribution is exactly 0 in f32.
    rem = n % _LANES
    if rem:
        pad = _LANES - rem
        x_flat = jnp.pad(x_flat, (0, pad), constant_values=100.0)
        t_flat = jnp.pad(t_flat, (0, pad), constant_values=1)
    rows = (n + _LANES - 1) // _LANES

    # Tile sizing: big lane-dense DMA blocks (amortize ~0.35us/step overhead),
    # chunked compute inside the kernel (bound VMEM temporaries).
    chunk_rows = max(32, (int(chunk_rows) // 32) * 32)
    block_rows = max(chunk_rows, (int(block_rows) // chunk_rows) * chunk_rows)
    if rows <= chunk_rows:
        block_rows = chunk_rows = rows          # single exact (full-dim) block
    elif rows < block_rows:
        block_rows = (rows // chunk_rows) * chunk_rows

    n_blocks = pl.cdiv(rows, block_rows)
    need_row_mask = (rows % block_rows) != 0    # partial final block exists

    # Outer "parallel" axis: engage whenever >= 2 blocks exist (2-TC chips).
    n_outer = n_outer_max if (n_outer_max > 1 and n_blocks >= 2) else 1
    n_outer = min(n_outer, n_blocks)
    n_inner = pl.cdiv(n_blocks, n_outer)
    has_dup = (n_outer * n_inner) != n_blocks

    if has_dup:
        # Clamp so the duplicated tail block never DMAs out of bounds; the
        # kernel gates its contribution with pl.when.
        in_idx = lambda o, i: (jnp.minimum(o * n_inner + i, n_blocks - 1), 0)
    else:
        in_idx = lambda o, i: (o * n_inner + i, 0)

    x2d = x_flat.reshape(rows, _LANES)
    t2d = t_flat.reshape(rows, _LANES)

    kernel = functools.partial(
        _focal_loss_kernel,
        alpha=float(alpha), gamma=float(gamma),
        rows_valid=rows, block_rows=block_rows, chunk_rows=chunk_rows,
        n_inner=n_inner, n_blocks=n_blocks,
        need_row_mask=need_row_mask, has_dup_blocks=has_dup,
    )

    # Explicit VMEM budget: 2 inputs x 2 pipeline buffers + chunk temporaries
    # + slack.  Fits v5e/v6e/v7x (v7x: 64 MiB physical).
    in_block_bytes = block_rows * _LANES * (x2d.dtype.itemsize
                                            + t2d.dtype.itemsize)
    vmem_limit = int(2 * in_block_bytes
                     + 16 * chunk_rows * _LANES * 4
                     + (4 << 20))
    vmem_limit = max(vmem_limit, 16 << 20)

    partials = pl.pallas_call(
        kernel,
        out_shape=jax.ShapeDtypeStruct((n_outer, 1), jnp.float32),
        grid=(n_outer, n_inner),
        in_specs=[
            pl.BlockSpec((block_rows, _LANES), in_idx),
            pl.BlockSpec((block_rows, _LANES), in_idx),
        ],
        out_specs=pl.BlockSpec((1, 1), lambda o, i: (o, 0),
                               memory_space=pltpu.SMEM),
        scratch_shapes=[pltpu.VMEM((8, _LANES), jnp.float32)],
        compiler_params=pltpu.CompilerParams(
            dimension_semantics=("parallel", "arbitrary"),
            vmem_limit_bytes=vmem_limit,
        ),
    )(x2d, t2d)

    return jnp.sum(partials) / jnp.float32(n)


def focal_loss_ref(inputs, targets, alpha=1.0, gamma=2.0):
    x = inputs.astype(jnp.float32)
    t = targets.astype(jnp.float32)
    bce = jnp.maximum(x, 0.0) - x * t + jnp.log1p(jnp.exp(-jnp.abs(x)))
    pt = jnp.exp(-bce)
    return jnp.mean(alpha * (1.0 - pt) ** gamma * bce)


if __name__ == "__main__":
    key = jax.random.PRNGKey(0)
    k1, k2 = jax.random.split(key)

    # Segmentation-style inputs: logits NCHW (N=2, C=4, H=16, W=16),
    # binary targets of the same shape.
    logits = jax.random.normal(k1, (2, 4, 16, 16), dtype=jnp.float32) * 2.0
    targets = (jax.random.uniform(k2, (2, 4, 16, 16)) > 0.5).astype(jnp.float32)

    loss = focal_loss(logits, targets, alpha=1.0, gamma=2.0)
    loss = jax.block_until_ready(loss)

    ref = focal_loss_ref(logits, targets, alpha=1.0, gamma=2.0)
    assert jnp.allclose(loss, ref, rtol=1e-5, atol=1e-6), (loss, ref)

    print("KERNEL_OK")
</pallas_src>

<mosaic_0001>
module attributes {stable_mosaic.version = 11 : i64} {
  func.func @_focal_loss_kernel(%arg0: i32, %arg1: i32, %arg2: memref<16x128xf32, #tpu.memory_space<vmem>>, %arg3: memref<16x128xf32, #tpu.memory_space<vmem>>, %arg4: memref<1x1xf32, #tpu.memory_space<smem>>, %arg5: memref<8x128xf32, #tpu.memory_space<vmem>>) attributes {dimension_semantics = [#tpu.dimension_semantics<parallel>, #tpu.dimension_semantics<arbitrary>], iteration_bounds = array<i64: 1, 1>, scalar_prefetch = 0 : i64, scratch_operands = 1 : i64, tpu.core_type = #tpu.core_type<tc>, window_params = [{transform_indices = @transform_0, window_bounds = array<i64: 16, 128>}, {transform_indices = @transform_1, window_bounds = array<i64: 16, 128>}, {transform_indices = @transform_2, window_bounds = array<i64: 1, 1>}]} {
    %c0_i32 = arith.constant 0 : i32
    %0 = arith.cmpi eq, %arg1, %c0_i32 : i32
    %1 = arith.extui %0 : i1 to i32
    %c0_i32_0 = arith.constant 0 : i32
    %2 = arith.cmpi ne, %1, %c0_i32_0 : i32
    scf.if %2 {
      %cst_14 = arith.constant 0.000000e+00 : f32
      %30 = vector.broadcast %cst_14 : f32 to vector<8x128xf32>
      %c0_15 = arith.constant 0 : index
      %c0_16 = arith.constant 0 : index
      %31 = vector.load %arg5[%c0_15, %c0_16] : memref<8x128xf32, #tpu.memory_space<vmem>>, vector<8x128xf32>
      tpu.vector_store %arg5[%c0_15, %c0_16], %30 {strides = array<i32>} : memref<8x128xf32, #tpu.memory_space<vmem>>, vector<8x128xf32>,
    } else {
    }
    %c0 = arith.constant 0 : index
    %c0_1 = arith.constant 0 : index
    %3 = vector.load %arg2[%c0, %c0_1] : memref<16x128xf32, #tpu.memory_space<vmem>>, vector<16x128xf32>
    %c0_2 = arith.constant 0 : index
    %c0_3 = arith.constant 0 : index
    %4 = vector.load %arg3[%c0_2, %c0_3] : memref<16x128xf32, #tpu.memory_space<vmem>>, vector<16x128xf32>
    %cst = arith.constant 0.000000e+00 : f32
    %5 = vector.broadcast %cst : f32 to vector<16x128xf32>
    %6 = arith.maximumf %3, %5 : vector<16x128xf32>
    %7 = arith.mulf %3, %4 : vector<16x128xf32>
    %8 = arith.subf %6, %7 : vector<16x128xf32>
    %9 = math.absf %3 : vector<16x128xf32>
    %cst_4 = arith.constant 0.000000e+00 : f32
    %10 = vector.broadcast %cst_4 : f32 to vector<16x128xf32>
    %11 = arith.subf %10, %9 : vector<16x128xf32>
    %12 = math.exp %11 : vector<16x128xf32>
    %13 = math.log1p %12 : vector<16x128xf32>
    %14 = arith.addf %8, %13 : vector<16x128xf32>
    %cst_5 = arith.constant 0.000000e+00 : f32
    %15 = vector.broadcast %cst_5 : f32 to vector<16x128xf32>
    %16 = arith.subf %15, %14 : vector<16x128xf32>
    %17 = math.exp %16 : vector<16x128xf32>
    %cst_6 = arith.constant 1.000000e+00 : f32
    %18 = vector.broadcast %cst_6 : f32 to vector<16x128xf32>
    %19 = arith.subf %18, %17 : vector<16x128xf32>
    %20 = arith.mulf %19, %19 : vector<16x128xf32>
    %21 = arith.mulf %20, %14 : vector<16x128xf32>
    %c0_7 = arith.constant 0 : index
    %c0_8 = arith.constant 0 : index
    %22 = vector.load %arg5[%c0_7, %c0_8] : memref<8x128xf32, #tpu.memory_space<vmem>>, vector<8x128xf32>
    %23 = vector.shape_cast %21 : vector<16x128xf32> to vector<2x8x128xf32>
    %cst_9 = arith.constant dense<0.000000e+00> : vector<8x128xf32>
    %24 = vector.multi_reduction <add>, %23, %cst_9 [0] : vector<2x8x128xf32> to vector<8x128xf32>
    %25 = arith.addf %22, %24 : vector<8x128xf32>
    %c0_10 = arith.constant 0 : index
    %c0_11 = arith.constant 0 : index
    %26 = vector.load %arg5[%c0_10, %c0_11] : memref<8x128xf32, #tpu.memory_space<vmem>>, vector<8x128xf32>
    tpu.vector_store %arg5[%c0_10, %c0_11], %25 {strides = array<i32>} : memref<8x128xf32, #tpu.memory_space<vmem>>, vector<8x128xf32>,
    %c0_i32_12 = arith.constant 0 : i32
    %27 = arith.cmpi eq, %arg1, %c0_i32_12 : i32
    %28 = arith.extui %27 : i1 to i32
    %c0_i32_13 = arith.constant 0 : i32
    %29 = arith.cmpi ne, %28, %c0_i32_13 : i32
    scf.if %29 {
      %c0_14 = arith.constant 0 : index
      %c0_15 = arith.constant 0 : index
      %30 = vector.load %arg5[%c0_14, %c0_15] : memref<8x128xf32, #tpu.memory_space<vmem>>, vector<8x128xf32>
      %31 = vector.shape_cast %30 : vector<8x128xf32> to vector<1x8x128xf32>
      %cst_16 = arith.constant dense<0.000000e+00> : vector<1xf32>
      %32 = vector.multi_reduction <add>, %31, %cst_16 [1, 2] : vector<1x8x128xf32> to vector<1xf32>
      %33 = vector.shape_cast %32 : vector<1xf32> to vector<1x1x1xf32>
      %34 = vector.extract %33[0, 0, 0] : f32 from vector<1x1x1xf32>
      %c0_17 = arith.constant 0 : index
      %c0_18 = arith.constant 0 : index
      %35 = memref.load %arg4[%c0_17, %c0_18] : memref<1x1xf32, #tpu.memory_space<smem>>
      memref.store %34, %arg4[%c0_17, %c0_18] : memref<1x1xf32, #tpu.memory_space<smem>>
    } else {
    }
    return
  }
  func.func @transform_0(%arg0: i32, %arg1: i32) -> (i32, i32) {
    %c1_i32 = arith.constant 1 : i32
    %0 = arith.muli %arg0, %c1_i32 : i32
    %1 = arith.addi %0, %arg1 : i32
    %c0_i32 = arith.constant 0 : i32
    %c0_i32_0 = arith.constant 0 : i32
    return %1, %c0_i32 : i32, i32
  }
  func.func @transform_1(%arg0: i32, %arg1: i32) -> (i32, i32) {
    %c1_i32 = arith.constant 1 : i32
    %0 = arith.muli %arg0, %c1_i32 : i32
    %1 = arith.addi %0, %arg1 : i32
    %c0_i32 = arith.constant 0 : i32
    %c0_i32_0 = arith.constant 0 : i32
    return %1, %c0_i32 : i32, i32
  }
  func.func @transform_2(%arg0: i32, %arg1: i32) -> (i32, i32) {
    %c0_i32 = arith.constant 0 : i32
    %c0_i32_0 = arith.constant 0 : i32
    return %arg0, %c0_i32 : i32, i32
  }
}

</mosaic_0001>

<bundles_post_ra>
// kernel: tpu_custom_call.1
= control target key start
LH: loop header
LB: loop body
LE: loop exit
PB: predicated region body
PF: predicated region fallthrough
CT: control target
= control target key end

     0   :  { %7 = vsyncpa [#allocation4], 0  ;;  %s276_s0 = inlined_call_operand.hbm [shape: f32[16,128], index: 0, kind: input, shape index: {}]   ;;  %s277_s1 = inlined_call_operand.hbm [shape: f32[16,128], index: 1, kind: input, shape index: {}]   ;;  %s278_s2 = inlined_call_operand.hbm [shape: f32[1,1], index: 2, kind: output, shape index: {}]  }
   0x1   :  { %8 = vsyncpa [#allocation7], 0 }
   0x2   :  { %9 = vsyncpa [#allocation5], 0  ;;  %s220_s9 = smov [#allocation3]   ;;  %s160_s13 = scalar_lea.hbm %s276_s0, 256 }
   0x3   :  { %s19_s10 = sshll.u32 %s220_s9, 4  ;;  %p161_p0 = scmp.ne.s32.totalorder %s276_s0, %s160_s13  ;;  %s20_s10 = int_to_ptr.vmem [resolvable:$true] %s19_s10 }
   0x4   :  { %p164_p1 = scmp.lt.u32.totalorder %s160_s13, %s276_s0 }
   0x6   :  { %p166_p2 = pnand %p164_p1, %p161_p0 }
   0x8   :  { %169 = shalt.err (!%p166_p2)
}
   0x9   :  { %s170_s18 = scalar_lea.vmem %s20_s10, 256  ;;  %p175_p4 = scmp.lt.s32.totalorder %s20_s10, %s20_s10 }
   0xa   :  { %p171_p3 = scmp.ne.s32.totalorder %s20_s10, %s170_s18  ;;  %p176_p5 = scmp.lt.s32.totalorder %s170_s18, %s170_s18 }
   0xc   :  { %p177_p6 = por %p176_p5, %p175_p4 }
   0xe   :  { %p178_p7 = pnand %p177_p6, %p171_p3 }
  0x10   :  { %181 = shalt.err (!%p178_p7)
}
  0x11   :  { %s221_s19 = smov 128   ;;  %s222_s20 = smov 8  }
  0x12   :  { %25 = dma.hbm_to_vmem [thread:$0]  %s276_s0, 256, %s20_s10, [#allocation4], %s221_s19, %s221_s19, %s222_s20  }
  0x13   :  { %s223_s23 = smov [#allocation6]   ;;  %s182_s27 = scalar_lea.hbm %s277_s1, 256 }
  0x14   :  { %s35_s24 = sshll.u32 %s223_s23, 4  ;;  %p183_p8 = scmp.ne.s32.totalorder %s277_s1, %s182_s27  ;;  %s36_s24 = int_to_ptr.vmem [resolvable:$true] %s35_s24 }
  0x15   :  { %p186_p9 = scmp.lt.u32.totalorder %s182_s27, %s277_s1 }
  0x17   :  { %p188_p10 = pnand %p186_p9, %p183_p8 }
  0x19   :  { %191 = shalt.err (!%p188_p10)
}
  0x1a   :  { %s192_s4 = scalar_lea.vmem %s36_s24, 256  ;;  %p197_p12 = scmp.lt.s32.totalorder %s36_s24, %s36_s24 }
  0x1b   :  { %p193_p11 = scmp.ne.s32.totalorder %s36_s24, %s192_s4  ;;  %p198_p13 = scmp.lt.s32.totalorder %s192_s4, %s192_s4 }
  0x1d   :  { %p199_p0 = por %p198_p13, %p197_p12 }
  0x1f   :  { %p200_p1 = pnand %p199_p0, %p193_p11 }
  0x21   :  { %203 = shalt.err (!%p200_p1)
}
  0x22   :  { %41 = dma.hbm_to_vmem [thread:$0]  %s277_s1, 256, %s36_s24, [#allocation7], %s221_s19, %s221_s19, %s222_s20  }
  0x23   :  { %214 = dma.done.wait [#allocation4], 256  }
  0x24   :  { %215 = vsyncadd [#allocation4], 4294967040 }
  0x25   :  { %216 = dma.done.wait [#allocation7], 256  }
  0x26   :  { %217 = vsyncadd [#allocation7], 4294967040  ;;  %v57_v0 = vld [vmem:[#allocation3] sm:$0xff]  ;;  %v58_v1 = vld [vmem:[#allocation3 + $0x8] sm:$0xff]  ;;  %s204_s8 = scalar_lea.hbm %s278_s2, 16 }
  0x27   :  { %v67_v2 = vand.u32 2147483647, %v57_v0  ;;  %v68_v3 = vand.u32 2147483647, %v58_v1  ;;  %v59_v14 = vld [vmem:[#allocation6] sm:$0xff]  ;;  %v60_v15 = vld [vmem:[#allocation6 + $0x8] sm:$0xff]  ;;  %p205_p2 = scmp.ne.s32.totalorder %s278_s2, %s204_s8  ;;  %p208_p3 = scmp.lt.u32.totalorder %s204_s8, %s278_s2 }
  0x28   :  { %v61_v17 = vmax.f32 %v57_v0, 0.0  ;;  %v63_v18 = vmul.f32 %v59_v14, %v57_v0  ;;  %v62_v21 = vmax.f32 %v58_v1, 0.0  ;;  %v64_v22 = vmul.f32 %v60_v15, %v58_v1 }
  0x29   :  { %v69_v4 = vsub.f32 0.0, %v67_v2  ;;  %v70_v5 = vsub.f32 0.0, %v68_v3  ;;  %p210_p4 = pnand %p208_p3, %p205_p2 }
  0x2a   :  { %v65_v26 = vsub.f32 %v61_v17, %v63_v18  ;;  %v66_v29 = vsub.f32 %v62_v21, %v64_v22 }
  0x2b   :  { %v71_v6 = vmul.f32 1.442695, %v69_v4  ;;  %v73_v7 = vmul.f32 1.442695, %v70_v5 }
  0x2d   :  { %148 = vpow2.f32 %v71_v6 }
  0x2e   :  { %150 = vpow2.f32 %v73_v7 }
  0x37   :  { %v149_v8 = vpop.eup %148 }
  0x38   :  { %v151_v9 = vpop.eup %150  ;;  %v75_v10 = vadd.f32 1.0, %v149_v8  ;;  %v78_v12 = vmul.f32 -0.5, %v149_v8  ;;  %v81_v19 = vand.u32 2147483647, %v149_v8 }
  0x39   :  { %v84_v11 = vadd.f32 1.0, %v151_v9  ;;  %v87_v13 = vmul.f32 -0.5, %v151_v9  ;;  %v90_v23 = vand.u32 2147483647, %v151_v9 }
  0x3a   :  { %152 = vlog2.f32 %v75_v10  ;;  %v79_v16 = vadd.f32 1.0, %v78_v12  ;;  %vm82_vm0 = vcmp.lt.f32.partialorder %v81_v19, 0.0004427343 }
  0x3b   :  { %154 = vlog2.f32 %v84_v11  ;;  %v88_v20 = vadd.f32 1.0, %v87_v13  ;;  %vm91_vm1 = vcmp.lt.f32.partialorder %v90_v23, 0.0004427343 }
  0x3c   :  { %v80_v24 = vmul.f32 %v149_v8, %v79_v16 }
  0x3d   :  { %v89_v27 = vmul.f32 %v151_v9, %v88_v20 }
  0x44   :  { %v153_v25 = vpop.eup %152 }
  0x45   :  { %v155_v28 = vpop.eup %154  ;;  %v77_v30 = vmul.f32 0.6931472, %v153_v25 }
  0x46   :  { %v86_v31 = vmul.f32 0.6931472, %v155_v28 }
  0x47   :  { %v83_v32 = vsel %vm82_vm0, %v80_v24, %v77_v30 }
  0x48   :  { %v92_v33 = vsel %vm91_vm1, %v89_v27, %v86_v31  ;;  %v93_v34 = vadd.f32 %v83_v32, %v65_v26 }
  0x49   :  { %v94_v35 = vadd.f32 %v92_v33, %v66_v29 }
  0x4a   :  { %v95_v36 = vsub.f32 0.0, %v93_v34 }
  0x4b   :  { %v96_v37 = vsub.f32 0.0, %v94_v35 }
  0x4c   :  { %v97_v38 = vmul.f32 1.442695, %v95_v36 }
  0x4d   :  { %v99_v39 = vmul.f32 1.442695, %v96_v37 }
  0x4e   :  { %156 = vpow2.f32 %v97_v38 }
  0x4f   :  { %158 = vpow2.f32 %v99_v39 }
  0x58   :  { %v157_v40 = vpop.eup %156 }
  0x59   :  { %v159_v41 = vpop.eup %158  ;;  %v101_v42 = vsub.f32 1.0, %v157_v40 }
  0x5a   :  { %v102_v43 = vsub.f32 1.0, %v159_v41 }
  0x5b   :  { %v103_v44 = vmul.f32 %v101_v42, %v101_v42 }
  0x5c   :  { %v104_v45 = vmul.f32 %v102_v43, %v102_v43 }
  0x5d   :  { %v105_v46 = vmul.f32 %v103_v44, %v93_v34 }
  0x5e   :  { %v106_v47 = vmul.f32 %v104_v45, %v94_v35 }
  0x60   :  { %v108_v48 = vadd.f32 %v106_v47, %v105_v46 }
  0x62   :  { %115 = vadd.xlane.f32.xlu0 %v108_v48 }
  0xef   :  { %v116_v49 = vpop.xlane.xlu0 %115 }
  0xf0   :  { %v117_v50 = vrot.slane %v116_v49, 4 }
  0xf2   :  { %v118_v51 = vadd.f32 %v117_v50, %v116_v49 }
  0xf4   :  { %v119_v52 = vrot.slane %v118_v51, 2 }
  0xf6   :  { %v120_v53 = vadd.f32 %v119_v52, %v118_v51 }
  0xf8   :  { %v121_v54 = vrot.slane %v120_v53, 1 }
  0xfa   :  { %v122_v55 = vadd.f32 %v121_v54, %v120_v53 }
  0xfc   :  { %141 = vpush %v122_v55 }
 0x12d   :  { %s142_s1 = spop %141 }
 0x12e   :  { %125 = sst [smem:[#allocation8]] %s142_s1 }
 0x12f   :  { %213 = shalt.err (!%p210_p4)
}
 0x130   :  { %s224_s13 = smov [#allocation8]  }
 0x131   :  { %133 = dma.smem_to_hbm %s224_s13, 16, %s278_s2, [#allocation5]  }
 0x132   :  { %218 = dma.done.wait [#allocation5], 16  }
 0x133   :  { %219 = vsyncadd [#allocation5], 4294967280 }
 0x134   :  { %137 = sfence }
 0x135   :  { %138 = vsyncpa [#allocation4], 1 }
 0x136   :  { %139 = vsyncpa [#allocation7], 1 }
 0x137   :  { %140 = vsyncpa [#allocation5], 1 }

</bundles_post_ra>
